<compile_context>
chip_gen: v7x
topology: tpu7x:2x2x1
jax: 0.10.0
libtpu: 0.0.40
codegen_flags: <defaults>
</compile_context>

<pallas_src>
import jax
import jax.numpy as jnp
from jax.experimental import pallas as pl
from jax.experimental.pallas import tpu as pltpu


def pointgencon_kernel(x_ref,
                       w1_ref, b1_ref,
                       w2_ref, b2_ref,
                       w3_ref, b3_ref,
                       w4_ref, b4_ref,
                       o_ref):
    # x_ref: (C0, TN) f32.  wK_ref: (Cout_k, Cin_k) bf16.  bK_ref: (Cout_k, 1) f32.
    x = x_ref[...].astype(jnp.bfloat16)  # cast in-kernel (no wrapper HBM pass)

    h = jnp.dot(w1_ref[...], x, preferred_element_type=jnp.float32) + b1_ref[...]
    h = jnp.maximum(h, 0.0)

    h = jnp.dot(w2_ref[...], h.astype(jnp.bfloat16),
                preferred_element_type=jnp.float32) + b2_ref[...]
    h = jnp.maximum(h, 0.0)

    h = jnp.dot(w3_ref[...], h.astype(jnp.bfloat16),
                preferred_element_type=jnp.float32) + b3_ref[...]
    h = jnp.maximum(h, 0.0)

    # Layer 4 is (3, C2) @ (C2, TN): ~0.1% of FLOPs, hidden under layers 1-3.
    y = jnp.dot(w4_ref[...], h.astype(jnp.bfloat16),
                preferred_element_type=jnp.float32) + b4_ref[...]
    o_ref[...] = jnp.tanh(y).astype(o_ref.dtype)  # (3, TN), lane-dense store


def _vmem_limit_bytes(C0, C1, C2, C3, tile_n):
    """Explicit VMEM budget: resident weights (Buffered(1)) + double-buffered
    x/out tiles + in-kernel f32/bf16 intermediates, with ~25% headroom."""
    bf16, f32 = 2, 4
    weights = (C0 * C0 + C1 * C0 + C2 * C1 + C3 * C2) * bf16    # single-buffered
    biases = (C0 + C1 + C2 + C3) * f32                          # single-buffered
    x_tiles = 2 * C0 * tile_n * f32                             # double-buffered input
    out_tiles = 2 * C3 * tile_n * f32                           # double-buffered output
    interm = (C0 + C1 + C2) * tile_n * (f32 + bf16) + C0 * tile_n * bf16
    budget = int((weights + biases + x_tiles + out_tiles + interm) * 1.25)
    # Never go below the sane 32 MiB default; cap at 64 MiB so the same config
    # also fits a v7x TensorCore's physical VMEM.
    return min(max(budget, 32 * 1024 * 1024), 64 * 1024 * 1024)


def pointgencon_pallas(x_bcn, params, tile_n=256):
    """x_bcn: (B, C0, N) float32  ->  (B, 3, N) float32"""
    B, C0, N = x_bcn.shape
    (w1, b1), (w2, b2), (w3, b3), (w4, b4) = params
    C1 = w2.shape[0]
    C2 = w3.shape[0]
    C3 = w4.shape[0]  # = 3

    # Pad N up to a multiple of tile_n (keeps MXU-aligned 256-lane tiles for
    # awkward point counts); padded columns are sliced off at the end.
    n_tiles = pl.cdiv(N, tile_n)
    N_pad = n_tiles * tile_n
    if N_pad != N:
        x_bcn = jnp.pad(x_bcn, ((0, 0), (0, 0), (0, N_pad - N)))

    def w_spec(shape):
        # Constant index_map -> fetched once; single buffer (no wasted copy).
        return pl.BlockSpec(shape, lambda b, n: (0, 0),
                            pipeline_mode=pl.Buffered(1))

    out = pl.pallas_call(
        pointgencon_kernel,
        out_shape=jax.ShapeDtypeStruct((B, C3, N_pad), jnp.float32),
        grid_spec=pltpu.PrefetchScalarGridSpec(
            num_scalar_prefetch=0,
            grid=(B, n_tiles),
            in_specs=[
                pl.BlockSpec((None, C0, tile_n), lambda b, n: (b, 0, n)),  # x tile (f32)
                w_spec((C0, C0)), w_spec((C0, 1)),   # layer 1 (BN folded)
                w_spec((C1, C0)), w_spec((C1, 1)),   # layer 2 (BN folded)
                w_spec((C2, C1)), w_spec((C2, 1)),   # layer 3 (BN folded)
                w_spec((C3, C2)), w_spec((C3, 1)),   # layer 4 (no BN)
            ],
            out_specs=pl.BlockSpec((None, C3, tile_n), lambda b, n: (b, 0, n)),
        ),
        compiler_params=pltpu.CompilerParams(
            dimension_semantics=("parallel", "parallel"),
            vmem_limit_bytes=_vmem_limit_bytes(C0, C1, C2, C3, tile_n)),
    )(x_bcn, w1, b1, w2, b2, w3, b3, w4, b4)

    if N_pad != N:
        out = out[:, :, :N]
    return out  # (B, 3, N)


def fold_bn(w, b, gamma, beta, mean, var, eps=1e-5):
    """Fold inference-mode BatchNorm1d into a kernel-size-1 Conv1d.

    w: (Cout, Cin) f32, b: (Cout,) f32.
    Returns (w_eff (Cout, Cin) bf16, b_eff (Cout, 1) f32).
    """
    scale = gamma / jnp.sqrt(var + eps)
    w_eff = w * scale[:, None]
    b_eff = scale * (b - mean) + beta
    return w_eff.astype(jnp.bfloat16), b_eff[:, None].astype(jnp.float32)


def make_params(key, bottleneck_size):
    C0 = bottleneck_size
    C1 = bottleneck_size // 2
    C2 = bottleneck_size // 4
    # 4 convs x 2 keys + 3 BNs x 4 keys = 20 keys.
    ks = jax.random.split(key, 20)
    k = iter(ks)

    def conv_init(kw, kb, cout, cin):
        bound = 1.0 / jnp.sqrt(cin)
        w = jax.random.uniform(kw, (cout, cin), jnp.float32, -bound, bound)
        b = jax.random.uniform(kb, (cout,), jnp.float32, -bound, bound)
        return w, b

    def bn_init(kg, kb, km, kv, c):
        gamma = 1.0 + 0.1 * jax.random.normal(kg, (c,), jnp.float32)
        beta = 0.1 * jax.random.normal(kb, (c,), jnp.float32)
        mean = 0.1 * jax.random.normal(km, (c,), jnp.float32)
        var = 1.0 + 0.1 * jax.random.uniform(kv, (c,), jnp.float32)
        return gamma, beta, mean, var

    w1, b1 = conv_init(next(k), next(k), C0, C0)
    w2, b2 = conv_init(next(k), next(k), C1, C0)
    w3, b3 = conv_init(next(k), next(k), C2, C1)
    w4, b4 = conv_init(next(k), next(k), 3, C2)

    bn1 = bn_init(next(k), next(k), next(k), next(k), C0)
    bn2 = bn_init(next(k), next(k), next(k), next(k), C1)
    bn3 = bn_init(next(k), next(k), next(k), next(k), C2)

    p1 = fold_bn(w1, b1, *bn1)
    p2 = fold_bn(w2, b2, *bn2)
    p3 = fold_bn(w3, b3, *bn3)
    p4 = (w4.astype(jnp.bfloat16), b4[:, None].astype(jnp.float32))
    return (p1, p2, p3, p4)


def pointgencon_ref(x_bcn, params):
    """Pure-JAX reference with matching bf16-operand / f32-accumulate semantics."""
    (w1, b1), (w2, b2), (w3, b3), (w4, b4) = params

    def mm(w_bf16, h_f32):
        return jnp.einsum(
            "oc,bcn->bon",
            w_bf16.astype(jnp.float32),
            h_f32.astype(jnp.bfloat16).astype(jnp.float32),
            precision=jax.lax.Precision.HIGHEST)

    h = jax.nn.relu(mm(w1, x_bcn) + b1[None])
    h = jax.nn.relu(mm(w2, h) + b2[None])
    h = jax.nn.relu(mm(w3, h) + b3[None])
    y = jnp.tanh(mm(w4, h) + b4[None])
    return y  # (B, 3, N)


if __name__ == "__main__":
    # Small shapes consistent with the module: bottleneck_size=32 (divisible
    # by 4), B=2 batches, N=500 points (deliberately NOT a multiple of the
    # 256-lane tile, to exercise the padded-tail path).
    bottleneck_size = 32
    B, N = 2, 500

    key = jax.random.PRNGKey(0)
    k_x, k_p = jax.random.split(key)
    x = jax.random.normal(k_x, (B, bottleneck_size, N), jnp.float32)
    params = make_params(k_p, bottleneck_size)

    out = pointgencon_pallas(x, params, tile_n=256)
    out = jax.block_until_ready(out)

    ref = pointgencon_ref(x, params)
    assert out.shape == (B, 3, N), out.shape
    max_err = float(jnp.max(jnp.abs(out - ref)))
    assert max_err < 5e-3, max_err

    print("KERNEL_OK")
</pallas_src>

<mosaic_0001>
module attributes {stable_mosaic.version = 11 : i64} {
  func.func @pointgencon_kernel(%arg0: i32, %arg1: i32, %arg2: memref<1x32x256xf32, #tpu.memory_space<vmem>>, %arg3: memref<32x32xbf16, #tpu.memory_space<vmem>>, %arg4: memref<32x1xf32, #tpu.memory_space<vmem>>, %arg5: memref<16x32xbf16, #tpu.memory_space<vmem>>, %arg6: memref<16x1xf32, #tpu.memory_space<vmem>>, %arg7: memref<8x16xbf16, #tpu.memory_space<vmem>>, %arg8: memref<8x1xf32, #tpu.memory_space<vmem>>, %arg9: memref<3x8xbf16, #tpu.memory_space<vmem>>, %arg10: memref<3x1xf32, #tpu.memory_space<vmem>>, %arg11: memref<1x3x256xf32, #tpu.memory_space<vmem>>) attributes {dimension_semantics = [#tpu.dimension_semantics<parallel>, #tpu.dimension_semantics<parallel>], iteration_bounds = array<i64: 2, 2>, scalar_prefetch = 0 : i64, scratch_operands = 0 : i64, tpu.core_type = #tpu.core_type<tc>, window_params = [{transform_indices = @transform_0, window_bounds = array<i64: 1, 32, 256>}, {pipeline_mode = #tpu.pipeline_mode<synchronous>, transform_indices = @transform_1, window_bounds = array<i64: 32, 32>}, {pipeline_mode = #tpu.pipeline_mode<synchronous>, transform_indices = @transform_2, window_bounds = array<i64: 32, 1>}, {pipeline_mode = #tpu.pipeline_mode<synchronous>, transform_indices = @transform_3, window_bounds = array<i64: 16, 32>}, {pipeline_mode = #tpu.pipeline_mode<synchronous>, transform_indices = @transform_4, window_bounds = array<i64: 16, 1>}, {pipeline_mode = #tpu.pipeline_mode<synchronous>, transform_indices = @transform_5, window_bounds = array<i64: 8, 16>}, {pipeline_mode = #tpu.pipeline_mode<synchronous>, transform_indices = @transform_6, window_bounds = array<i64: 8, 1>}, {pipeline_mode = #tpu.pipeline_mode<synchronous>, transform_indices = @transform_7, window_bounds = array<i64: 3, 8>}, {pipeline_mode = #tpu.pipeline_mode<synchronous>, transform_indices = @transform_8, window_bounds = array<i64: 3, 1>}, {transform_indices = @transform_9, window_bounds = array<i64: 1, 3, 256>}]} {
    %c0 = arith.constant 0 : index
    %c0_0 = arith.constant 0 : index
    %c0_1 = arith.constant 0 : index
    %0 = vector.load %arg2[%c0, %c0_0, %c0_1] : memref<1x32x256xf32, #tpu.memory_space<vmem>>, vector<1x32x256xf32>
    %1 = vector.shape_cast %0 : vector<1x32x256xf32> to vector<32x256xf32>
    %2 = arith.truncf %1 : vector<32x256xf32> to vector<32x256xbf16>
    %c0_2 = arith.constant 0 : index
    %c0_3 = arith.constant 0 : index
    %3 = vector.load %arg3[%c0_2, %c0_3] : memref<32x32xbf16, #tpu.memory_space<vmem>>, vector<32x32xbf16>
    %cst = arith.constant dense<0.000000e+00> : vector<32x256xf32>
    %4 = tpu.matmul %3, %2, %cst {dimension_numbers = #tpu.dot_dimension_numbers<[1], [0], [0], [1], [0, 0, 1, 1], [], []>} : vector<32x32xbf16>, vector<32x256xbf16>, vector<32x256xf32> -> vector<32x256xf32>
    %c0_4 = arith.constant 0 : index
    %c0_5 = arith.constant 0 : index
    %5 = vector.load %arg4[%c0_4, %c0_5] : memref<32x1xf32, #tpu.memory_space<vmem>>, vector<32x1xf32>
    %6 = vector.broadcast %5 : vector<32x1xf32> to vector<32x256xf32>
    %7 = arith.addf %4, %6 : vector<32x256xf32>
    %cst_6 = arith.constant 0.000000e+00 : f32
    %8 = vector.broadcast %cst_6 : f32 to vector<32x256xf32>
    %9 = arith.maximumf %7, %8 : vector<32x256xf32>
    %c0_7 = arith.constant 0 : index
    %c0_8 = arith.constant 0 : index
    %10 = vector.load %arg5[%c0_7, %c0_8] : memref<16x32xbf16, #tpu.memory_space<vmem>>, vector<16x32xbf16>
    %11 = arith.truncf %9 : vector<32x256xf32> to vector<32x256xbf16>
    %cst_9 = arith.constant dense<0.000000e+00> : vector<16x256xf32>
    %12 = tpu.matmul %10, %11, %cst_9 {dimension_numbers = #tpu.dot_dimension_numbers<[1], [0], [0], [1], [0, 0, 1, 1], [], []>} : vector<16x32xbf16>, vector<32x256xbf16>, vector<16x256xf32> -> vector<16x256xf32>
    %c0_10 = arith.constant 0 : index
    %c0_11 = arith.constant 0 : index
    %13 = vector.load %arg6[%c0_10, %c0_11] : memref<16x1xf32, #tpu.memory_space<vmem>>, vector<16x1xf32>
    %14 = vector.broadcast %13 : vector<16x1xf32> to vector<16x256xf32>
    %15 = arith.addf %12, %14 : vector<16x256xf32>
    %cst_12 = arith.constant 0.000000e+00 : f32
    %16 = vector.broadcast %cst_12 : f32 to vector<16x256xf32>
    %17 = arith.maximumf %15, %16 : vector<16x256xf32>
    %c0_13 = arith.constant 0 : index
    %c0_14 = arith.constant 0 : index
    %18 = vector.load %arg7[%c0_13, %c0_14] : memref<8x16xbf16, #tpu.memory_space<vmem>>, vector<8x16xbf16>
    %19 = arith.truncf %17 : vector<16x256xf32> to vector<16x256xbf16>
    %cst_15 = arith.constant dense<0.000000e+00> : vector<8x256xf32>
    %20 = tpu.matmul %18, %19, %cst_15 {dimension_numbers = #tpu.dot_dimension_numbers<[1], [0], [0], [1], [0, 0, 1, 1], [], []>} : vector<8x16xbf16>, vector<16x256xbf16>, vector<8x256xf32> -> vector<8x256xf32>
    %c0_16 = arith.constant 0 : index
    %c0_17 = arith.constant 0 : index
    %21 = vector.load %arg8[%c0_16, %c0_17] : memref<8x1xf32, #tpu.memory_space<vmem>>, vector<8x1xf32>
    %22 = vector.broadcast %21 : vector<8x1xf32> to vector<8x256xf32>
    %23 = arith.addf %20, %22 : vector<8x256xf32>
    %cst_18 = arith.constant 0.000000e+00 : f32
    %24 = vector.broadcast %cst_18 : f32 to vector<8x256xf32>
    %25 = arith.maximumf %23, %24 : vector<8x256xf32>
    %c0_19 = arith.constant 0 : index
    %c0_20 = arith.constant 0 : index
    %26 = vector.load %arg9[%c0_19, %c0_20] : memref<3x8xbf16, #tpu.memory_space<vmem>>, vector<3x8xbf16>
    %27 = arith.truncf %25 : vector<8x256xf32> to vector<8x256xbf16>
    %cst_21 = arith.constant dense<0.000000e+00> : vector<3x256xf32>
    %28 = tpu.matmul %26, %27, %cst_21 {dimension_numbers = #tpu.dot_dimension_numbers<[1], [0], [0], [1], [0, 0, 1, 1], [], []>} : vector<3x8xbf16>, vector<8x256xbf16>, vector<3x256xf32> -> vector<3x256xf32>
    %c0_22 = arith.constant 0 : index
    %c0_23 = arith.constant 0 : index
    %29 = vector.load %arg10[%c0_22, %c0_23] : memref<3x1xf32, #tpu.memory_space<vmem>>, vector<3x1xf32>
    %30 = vector.broadcast %29 : vector<3x1xf32> to vector<3x256xf32>
    %31 = arith.addf %28, %30 : vector<3x256xf32>
    %32 = math.tanh %31 : vector<3x256xf32>
    %c0_24 = arith.constant 0 : index
    %c0_25 = arith.constant 0 : index
    %c0_26 = arith.constant 0 : index
    %33 = vector.load %arg11[%c0_24, %c0_25, %c0_26] : memref<1x3x256xf32, #tpu.memory_space<vmem>>, vector<1x3x256xf32>
    %34 = vector.shape_cast %33 : vector<1x3x256xf32> to vector<3x256xf32>
    %35 = vector.shape_cast %32 : vector<3x256xf32> to vector<1x3x256xf32>
    tpu.vector_store %arg11[%c0_24, %c0_25, %c0_26], %35 {strides = array<i32>} : memref<1x3x256xf32, #tpu.memory_space<vmem>>, vector<1x3x256xf32>,
    return
  }
  func.func @transform_0(%arg0: i32, %arg1: i32) -> (i32, i32, i32) {
    %c0_i32 = arith.constant 0 : i32
    %c0_i32_0 = arith.constant 0 : i32
    return %arg0, %c0_i32, %arg1 : i32, i32, i32
  }
  func.func @transform_1(%arg0: i32, %arg1: i32) -> (i32, i32) {
    %c0_i32 = arith.constant 0 : i32
    %c0_i32_0 = arith.constant 0 : i32
    %c0_i32_1 = arith.constant 0 : i32
    return %c0_i32, %c0_i32_0 : i32, i32
  }
  func.func @transform_2(%arg0: i32, %arg1: i32) -> (i32, i32) {
    %c0_i32 = arith.constant 0 : i32
    %c0_i32_0 = arith.constant 0 : i32
    %c0_i32_1 = arith.constant 0 : i32
    return %c0_i32, %c0_i32_0 : i32, i32
  }
  func.func @transform_3(%arg0: i32, %arg1: i32) -> (i32, i32) {
    %c0_i32 = arith.constant 0 : i32
    %c0_i32_0 = arith.constant 0 : i32
    %c0_i32_1 = arith.constant 0 : i32
    return %c0_i32, %c0_i32_0 : i32, i32
  }
  func.func @transform_4(%arg0: i32, %arg1: i32) -> (i32, i32) {
    %c0_i32 = arith.constant 0 : i32
    %c0_i32_0 = arith.constant 0 : i32
    %c0_i32_1 = arith.constant 0 : i32
    return %c0_i32, %c0_i32_0 : i32, i32
  }
  func.func @transform_5(%arg0: i32, %arg1: i32) -> (i32, i32) {
    %c0_i32 = arith.constant 0 : i32
    %c0_i32_0 = arith.constant 0 : i32
    %c0_i32_1 = arith.constant 0 : i32
    return %c0_i32, %c0_i32_0 : i32, i32
  }
  func.func @transform_6(%arg0: i32, %arg1: i32) -> (i32, i32) {
    %c0_i32 = arith.constant 0 : i32
    %c0_i32_0 = arith.constant 0 : i32
    %c0_i32_1 = arith.constant 0 : i32
    return %c0_i32, %c0_i32_0 : i32, i32
  }
  func.func @transform_7(%arg0: i32, %arg1: i32) -> (i32, i32) {
    %c0_i32 = arith.constant 0 : i32
    %c0_i32_0 = arith.constant 0 : i32
    %c0_i32_1 = arith.constant 0 : i32
    return %c0_i32, %c0_i32_0 : i32, i32
  }
  func.func @transform_8(%arg0: i32, %arg1: i32) -> (i32, i32) {
    %c0_i32 = arith.constant 0 : i32
    %c0_i32_0 = arith.constant 0 : i32
    %c0_i32_1 = arith.constant 0 : i32
    return %c0_i32, %c0_i32_0 : i32, i32
  }
  func.func @transform_9(%arg0: i32, %arg1: i32) -> (i32, i32, i32) {
    %c0_i32 = arith.constant 0 : i32
    %c0_i32_0 = arith.constant 0 : i32
    return %arg0, %c0_i32, %arg1 : i32, i32, i32
  }
}

</mosaic_0001>

<bundles_post_ra>
// kernel: tpu_custom_call.1
= control target key start
LH: loop header
LB: loop body
LE: loop exit
PB: predicated region body
PF: predicated region fallthrough
CT: control target
= control target key end

     0   :  { %s1255_s0 = inlined_call_operand.hbm [shape: f32[2,32,512], index: 0, kind: input, shape index: {}]   ;;  %s1256_s1 = inlined_call_operand.vmem [shape: bf16[32,32], index: 1, kind: input, shape index: {}]   ;;  %s1257_s2 = inlined_call_operand.vmem [shape: f32[32,1], index: 2, kind: input, shape index: {}]   ;;  %s1258_s3 = inlined_call_operand.vmem [shape: bf16[16,32], index: 3, kind: input, shape index: {}]   ;;  %s1259_s4 = inlined_call_operand.vmem [shape: f32[16,1], index: 4, kind: input, shape index: {}]   ;;  %s1260_s5 = inlined_call_operand.vmem [shape: bf16[8,16], index: 5, kind: input, shape index: {}]   ;;  %s1261_s6 = inlined_call_operand.vmem [shape: f32[8,1], index: 6, kind: input, shape index: {}]   ;;  %s1262_s7 = inlined_call_operand.vmem [shape: bf16[3,8], index: 7, kind: input, shape index: {}]   ;;  %s1263_s8 = inlined_call_operand.vmem [shape: f32[3,1], index: 8, kind: input, shape index: {}]   ;;  %s1264_s9 = inlined_call_operand.vmem [shape: f32[2,3,512], index: 9, kind: output, shape index: {}]  }
   0x1   :  { %1267 = sst [smem:[#allocation8_spill]] %s1260_s5 }
   0x2   :  { %1268 = sst [smem:[#allocation9_spill]] %s1262_s7 }
   0x3   :  { %1269 = sst [smem:[#allocation10_spill]] %s1264_s9 }
   0x4   :  { %14 = vsyncpa [#allocation3], 0 }
   0x5   :  { %16 = vsyncpa [#allocation3 + $0x1], 0  ;;  %s1056_s30 = smov 0   ;;  %s1058_s10 = smov 0  }
   0x6   :  { %s1060_s11 = smov 0   ;;  %s1062_s12 = smov 0  }
   0x7   :  { %s1064_s13 = smov 0   ;;  %s1066_s14 = smov 0  }
   0x8   :  { %s1068_s15 = smov 0   ;;  %s1070_s16 = smov 0  }
   0x9 LB: > { %1270 = sst [smem:[#allocation5_spill]] %s983_s12  ;;  %s795_s17 = sadd.s32 4294967295, %s999_s16   ;;  %s999_s16 = sphi %s1070_s16, %s22_s16   ;;  %s995_s15 = sphi %s1068_s15, %s1288_s15   ;;  %s991_s14 = sphi %s1066_s14, %s1287_s14   ;;  %s987_s13 = sphi %s1064_s13, %s1286_s13   ;;  %s983_s12 = sphi %s1062_s12, %s1285_s12   ;;  %s979_s11 = sphi %s1060_s11, %s1284_s11   ;;  %s975_s10 = sphi %s1058_s10, %s1283_s10   ;;  %s971_s30 = sphi %s1056_s30, %s1282_s30  }
   0xa   : > { %1271 = sst [smem:[#allocation6_spill]] %s987_s13  ;;  %s31_s18 = sadd.s32 1, %s991_s14 }
   0xb   : > { %p32_p0 = scmp.ge.s32.totalorder %s31_s18, 2  ;;  %s34_s19 = sadd.s32 1, %s995_s15 }
   0xc   : > { %s43_s20 = sadd.s32 1, %s979_s11  ;;  %p50_p1 = scmp.ne.s32.totalorder %s979_s11, %s975_s10 }
   0xd   : > { %s1290_s18 = smov (%p32_p0, %s31_s18), 0  ;;  %s1292_s19 = smov (!%p32_p0, %s34_s19), %s995_s15 }
   0xe   : > { %1272 = sst [smem:[#allocation7_spill]] %s1290_s18  ;;  %s39_s21 = ssub.s32 %s991_s14, %s1290_s18 }
   0xf   : > { %p51_p2 = scmp.eq.s32.totalorder %s999_s16, 0  ;;  %p36_p3 = scmp.ge.s32.totalorder %s1292_s19, 2 }
  0x10   : > { %p56_p4 = scmp.ne.s32.totalorder %s975_s10, %s971_s30  ;;  %p57_p6 = scmp.eq.s32.totalorder %s795_s17, 0 }
  0x11   : > { %p1107_p5 = por %p51_p2, %p50_p1  ;;  %s1294_s19 = smov (%p36_p3, %s1292_s19), 0 }
  0x12   : > { %p1113_p7 = por %p57_p6, %p56_p4  ;;  %s38_s24 = ssub.s32 %s995_s15, %s1294_s19 }
  0x13   : > { %p825_p8 = scmp.lt.s32.totalorder %s999_s16, 4  ;;  %s40_s25 = sor.u32 %s39_s21, %s38_s24 }
  0x14   : > { %s300_s26 = sand.u32 1, %s979_s11   ;;  %p41_p9 = scmp.eq.s32.totalorder %s40_s25, 0 }
  0x15   : > { %s799_s27 = sshll.u32 %s300_s26, 6  ;;  %s800_s28 = sshll.u32 %s991_s14, 1 }
  0x16   : > { %s1123_s29 = scalar_select %p41_p9, %s979_s11, %s43_s20  }
  0x17   : > { %s801_s30 = sshll.u32 %s995_s15, 4  ;;  %s304_s18 = scalar_lea.vmem [#allocation2], %s799_s27 }
  0x18   : > { %s310_s17 = sadd.s32 %s801_s30, %s800_s28  ;;  %s313_s9 = sshll.u32 %s304_s18, 4  ;;  %s1126_s9 = int_to_ptr.vmem [resolvable:$true] %s313_s9 }
  0x19   : > { %s802_s7 = sshll.u32 %s310_s17, 7  ;;  %p1137_p10 = pnand %p825_p8, %p1107_p5 }
  0x1a   : > { %s1131_s5 = scalar_lea.hbm %s1255_s0, %s802_s7  ;;  %s1141_s18 = scalar_lea.sflag [#allocation3], %s300_s26 }
  0x1b   : > { %s903_s21 = scalar_lea.hbm %s1131_s5, 1024  ;;  %p905_p12 = pneg %p1137_p10 }
  0x1c   : > { %p904_p11 = scmp.ne.s32.totalorder %s1131_s5, %s903_s21  ;;  %s908_s13 = scalar_lea.hbm %s1255_s0, 4096 }
  0x1d   : > { %p909_p1 = scmp.lt.u32.totalorder %s1131_s5, %s1255_s0  ;;  %p910_p2 = scmp.lt.u32.totalorder %s908_s13, %s903_s21 }
  0x1e   : > { %p906_p13 = pnand %p905_p12, %p904_p11  ;;  %p912_p4 = scmp.lt.u32.totalorder %s903_s21, %s1131_s5 }
  0x1f   : > { %p911_p3 = por %p910_p2, %p909_p1 }
  0x20   : > { %p907_p0 = pneg %p906_p13 }
  0x21   : > { %p913_p5 = por %p912_p4, %p911_p3 }
  0x23   : > { %p914_p6 = pnand %p913_p5, %p907_p0 }
  0x25   : > { %917 = shalt.err (!%p914_p6)
}
  0x26   : > { %s918_s25 = scalar_lea.vmem %s1126_s9, 1024  ;;  %s1001_s26 = smov [#allocation2]  }
  0x27   : > { %p919_p8 = scmp.ne.s32.totalorder %s1126_s9, %s918_s25  ;;  %s923_s27 = sshll.u32 %s1001_s26, 4  ;;  %s924_s27 = int_to_ptr.vmem [resolvable:$false] %s923_s27 }
  0x28   : > { %s925_s28 = scalar_lea.vmem %s924_s27, 2048  ;;  %p926_p13 = scmp.lt.s32.totalorder %s1126_s9, %s924_s27 }
  0x29   : > { %p921_p9 = pnand %p919_p8, %p905_p12  ;;  %p927_p1 = scmp.lt.s32.totalorder %s925_s28, %s918_s25 }
  0x2b   : > { %p922_p11 = pneg %p921_p9  ;;  %p928_p2 = por %p927_p1, %p926_p13 }
  0x2d   : > { %p929_p3 = pnand %p928_p2, %p922_p11 }
  0x2f   : > { %932 = shalt.err (!%p929_p3)
}
  0x30   : > { %s1002_s30 = smov 512   ;;  %s1003_s17 = smov 256  }
  0x31   : > { %s1004_s21 = smov 16   ;;  %p803_p12 = scmp.ge.s32.totalorder %s999_s16, 1 }
  0x32   : > { %824 = dma.hbm_to_vmem [thread:$0]  (!%p1137_p10), %s1131_s5, 1024, %s1126_s9, %s1141_s18, %s1002_s30, %s1003_s17, %s1004_s21  }
  0x33   : > { %p321_p0 = scmp.lt.s32.totalorder %s999_s16, 5 }
  0x35   : > { %p322_p4 = pnand %p803_p12, %p321_p0 }
  0x36   : > { %s327_s7 = sand.u32 (!%p322_p4), 1, %s975_s10  }
  0x37   : > { %325 = sbr.rel (%p322_p4) target bundleno = 984 (0x3d8), region = 56  ;;  %s804_s12 = sshll.u32 (!%p322_p4), %s327_s7, 6 }
  0x38   : > { %s328_s13 = scalar_lea.sflag (!%p322_p4), [#allocation3], %s327_s7  ;;  %s331_s22 = scalar_lea.vmem (!%p322_p4), [#allocation2], %s804_s12 }
  0x3e   : > { %966 = dma.done.wait (%p1113_p7), %s328_s13, 1024  }
  0x3f   : > { %968 = vsyncadd (%p1113_p7), %s328_s13, 4294966272  ;;  %v1005_v0 = vmov 0   ;;  %v383_v1 = vld [vmem:[%s331_s22 + $0x8] sm:$0xff]  ;;  %v385_v2 = vld [vmem:[%s331_s22 + $0x18] sm:$0xff]  ;;  %vm432_vm0 = vcmask 261120   ;;  %s1276_s26 = sld [smem:[#allocation8_spill]] }
  0x40   : > { %471 = vmatprep.mubr.bf16.mxu0 %v1005_v0  ;;  %894 = vset.pattern.permute.xlu0 %v1005_v0  ;;  %v382_v3 = vld [vmem:[%s331_s22] sm:$0xff]  ;;  %v391_v4 = vpack.c.bf16 %v385_v2, %v383_v1  ;;  %v384_v5 = vld [vmem:[%s331_s22 + $0x10] sm:$0xff]  ;;  %v387_v6 = vld [vmem:[%s331_s22 + $0x28] sm:$0xff]  ;;  %vm582_vm1 = vcmask 130048   ;;  %s1277_s27 = sld [smem:[#allocation5_spill]]  ;;  %s1278_s28 = sld [smem:[#allocation6_spill]] }
  0x41   : > { %895 = vset.pattern.permute.xlu1 %v1005_v0  ;;  %558 = vmatprep.mubr.bf16.mxu1 %v1005_v0  ;;  %v389_v7 = vld [vmem:[%s331_s22 + $0x38] sm:$0xff]  ;;  %v390_v8 = vpack.c.bf16 %v384_v5, %v382_v3  ;;  %v386_v10 = vld [vmem:[%s331_s22 + $0x20] sm:$0xff]  ;;  %v388_v11 = vld [vmem:[%s331_s22 + $0x30] sm:$0xff]  ;;  %vm642_vm2 = vcmask 1043456   ;;  %s1279_s21 = sld [smem:[#allocation9_spill]]  ;;  %vm638_vm3 = vcmask 64512  }
  0x42   : > { %v393_v9 = vpack.c.bf16 %v389_v7, %v387_v6  ;;  %439 = vmatprep.subr.bf16.mxu0 %v391_v4  ;;  %v392_v12 = vpack.c.bf16 %v388_v11, %v386_v10  ;;  %v398_v13 = vld [vmem:[%s1257_s2] sm:$0xff]  ;;  %v400_v14 = vld [vmem:[%s1257_s2 + $0x10] sm:$0xff]  ;;  %v399_v16 = vld [vmem:[%s1257_s2 + $0x8] sm:$0xff]  ;;  %s1280_s23 = sld [smem:[#allocation10_spill]] }
  0x43   : > { %440 = vmatpush1.bf16.msra.mxu0 %v390_v8  ;;  %404 = vperm.xlu0 %894, %v398_v13   ;;  %v896_v15 = vld [vmem:[%s1256_s1] sm:$0xff]   ;;  %v401_v17 = vld [vmem:[%s1257_s2 + $0x18] sm:$0xff]  ;;  %v507_v19 = vld [vmem:[%s1259_s4 + $0x8] sm:$0xff] }
  0x44   : > { %441 = vmatprep.subr.bf16.mxu0 %v393_v9  ;;  %414 = vperm.xlu1 %895, %v400_v14   ;;  %v506_v18 = vld [vmem:[%s1259_s4] sm:$0xff]  ;;  %v897_v21 = vld [vmem:[%s1256_s1 + $0x8] sm:$0xff]  }
  0x45   : > { %v576_v20 = vld [vmem:[%s1261_s6] sm:$0xff] }
  0x46   : > { %v632_v22 = vld [vmem:[%s1263_s8] sm:$0x7]  ;;  %s805_s7 = sshll.u32 %s1277_s27, 1  ;;  %p372_p7 = scmp.lt.s32.totalorder %s1278_s28, 1 }
  0x47   : > { %442 = vmatpush1.bf16.msra.mxu0 %v392_v12  ;;  %409 = vperm.xlu0 %894, %v399_v16   ;;  %v898_v55 = vld [vmem:[%s1258_s3] sm:$0xff]   ;;  %p374_p10 = scmp.lt.s32.totalorder %s805_s7, 3 }
  0x48   : > { %419 = vperm.xlu1 %895, %v401_v17   ;;  %s1296_s28 = smov (!%p372_p7, %s1278_s28), 1 }
  0x49   : > { %s1298_s7 = smov (!%p374_p10, %s805_s7), 3  ;;  %s806_s12 = sshll.u32 %s1296_s28, 2 }
  0x4a   : > { %810 = vmatmul.mubr.msk.bf16.vlgmr.msra.gmra.mrb[0].mxu0 %vm432_vm0, %v896_v15  ;;  %s377_s13 = sadd.s32 %s806_s12, %s1298_s7 }
  0x4b   : > { %481 = vmatprep.mubr.bf16.mxu0 %v1005_v0  ;;  %510 = vperm.xlu0 %894, %v506_v18   ;;  %s807_s22 = sshll.u32 %s377_s13, 2 }
  0x4c   : > { %515 = vperm.xlu1 %895, %v507_v19   ;;  %s379_s20 = scalar_lea.vmem %s1280_s23, %s807_s22 }
  0x4f   : > { %579 = vperm.xlu0 %894, %v576_v20  }
  0x50   : > { %635 = vperm.xlu1 %895, %v632_v22  }
  0x52   : > { %811 = vmatmul.mubr.msk.bf16.gmra.mrb[4].mxu0 %vm432_vm0, %v897_v21  ;;  %v629_v21 = vld [vmem:[%s1279_s21] sm:$0x3] }
  0x53   : > { %681 = vmatprep.mubr.bf16.mxu0 %v1005_v0 }
  0xc2   : > { %v405_v23 = vpop.permute.xlu0 %404 }
  0xc3   : > { %v415_v32 = vpop.permute.xlu1 %414 }
  0xc6   : > { %v410_v27 = vpop.permute.xlu0 %409 }
  0xc7   : > { %v420_v43 = vpop.permute.xlu1 %419 }
  0xca   : > { %v511_v56 = vpop.permute.xlu0 %510 }
  0xcb   : > { %v516_v60 = vpop.permute.xlu1 %515 }
  0xce   : > { %v580_v9 = vpop.permute.xlu0 %579 }
  0xcf   : > { %v636_v22 = vpop.permute.xlu1 %635 }
 0x11d   : > { %v473_v24 = vpop.f32.mrb[0].mxu0 }
 0x11e   : > { %v474_v25 = vadd.f32 %v473_v24, %v405_v23  ;;  %v475_v26 = vpop.f32.mrb[1].mxu0 }
 0x11f   : > { %v476_v28 = vadd.f32 %v475_v26, %v405_v23  ;;  %v477_v29 = vpop.f32.mrb[2].mxu0 }
 0x120   : > { %v478_v30 = vadd.f32 %v477_v29, %v410_v27  ;;  %v479_v31 = vpop.f32.mrb[3].mxu0  ;;  %v492_v34 = vmax.f32 %v474_v25, 0.0 }
 0x121   : > { %v480_v33 = vadd.f32 %v479_v31, %v410_v27  ;;  %v493_v36 = vmax.f32 %v476_v28, 0.0 }
 0x122   : > { %v494_v35 = vmax.f32 %v478_v30, 0.0 }
 0x123   : > { %v495_v37 = vmax.f32 %v480_v33, 0.0 }
 0x124   : > { %v502_v38 = vpack.c.bf16 %v494_v35, %v492_v34 }
 0x125   : > { %v483_v39 = vpop.f32.mrb[4].mxu0  ;;  %v503_v40 = vpack.c.bf16 %v495_v37, %v493_v36 }
 0x126   : > { %v484_v41 = vadd.f32 %v483_v39, %v415_v32  ;;  %v485_v42 = vpop.f32.mrb[5].mxu0 }
 0x127   : > { %v486_v44 = vadd.f32 %v485_v42, %v415_v32  ;;  %v487_v45 = vpop.f32.mrb[6].mxu0  ;;  %526 = vmatprep.subr.bf16.mxu1 %v503_v40 }
 0x128   : > { %v488_v46 = vadd.f32 %v487_v45, %v420_v43  ;;  %v489_v47 = vpop.f32.mrb[7].mxu0  ;;  %527 = vmatpush1.bf16.msra.mxu1 %v502_v38  ;;  %v496_v49 = vmax.f32 %v484_v41, 0.0 }
 0x129   : > { %v490_v48 = vadd.f32 %v489_v47, %v420_v43  ;;  %v497_v51 = vmax.f32 %v486_v44, 0.0 }
 0x12a   : > { %v498_v50 = vmax.f32 %v488_v46, 0.0 }
 0x12b   : > { %v499_v52 = vmax.f32 %v490_v48, 0.0 }
 0x12c   : > { %v504_v53 = vpack.c.bf16 %v498_v50, %v496_v49 }
 0x12d   : > { %v505_v54 = vpack.c.bf16 %v499_v52, %v497_v51 }
 0x12f   : > { %528 = vmatprep.subr.bf16.mxu1 %v505_v54 }
 0x130   : > { %529 = vmatpush1.bf16.msra.mxu1 %v504_v53 }
 0x133   : > { %813 = vmatmul.mubr.msk.bf16.vlgmr.msra.gmra.mrb[0].mxu1 %vm432_vm0, %v898_v55 }
 0x134   : > { %618 = vmatprep.mubr.bf16.mxu1 %v1005_v0  ;;  %v573_v0 = vld [vmem:[%s1276_s26] sm:$0xf] }
 0x206   : > { %v560_v57 = vpop.f32.mrb[0].mxu1 }
 0x207   : > { %v561_v58 = vadd.f32 %v560_v57, %v511_v56  ;;  %v562_v59 = vpop.f32.mrb[1].mxu1 }
 0x208   : > { %v563_v61 = vadd.f32 %v562_v59, %v511_v56  ;;  %v564_v62 = vpop.f32.mrb[2].mxu1 }
 0x209   : > { %v565_v63 = vadd.f32 %v564_v62, %v516_v60  ;;  %v566_v1 = vpop.f32.mrb[3].mxu1  ;;  %v569_v3 = vmax.f32 %v561_v58, 0.0 }
 0x20a   : > { %v567_v2 = vadd.f32 %v566_v1, %v516_v60  ;;  %v570_v5 = vmax.f32 %v563_v61, 0.0 }
 0x20b   : > { %v571_v4 = vmax.f32 %v565_v63, 0.0 }
 0x20c   : > { %v572_v6 = vmax.f32 %v567_v2, 0.0 }
 0x20d   : > { %v574_v7 = vpack.c.bf16 %v571_v4, %v569_v3 }
 0x20e   : > { %v575_v8 = vpack.c.bf16 %v572_v6, %v570_v5 }
 0x210   : > { %586 = vmatprep.subr.bf16.mxu1 %v575_v8 }
 0x211   : > { %587 = vmatpush1.bf16.msra.mxu1 %v574_v7 }
 0x214   : > { %814 = vmatmul.mubr.msk.bf16.vlgmr.msra.gmra.mrb[4].mxu1 %vm582_vm1, %v573_v0 }
 0x2e7   : > { %v620_v10 = vpop.f32.mrb[4].mxu1 }
 0x2e8   : > { %v621_v11 = vadd.f32 %v620_v10, %v580_v9  ;;  %v622_v12 = vpop.f32.mrb[5].mxu1 }
 0x2e9   : > { %v623_v13 = vadd.f32 %v622_v12, %v580_v9  ;;  %v624_v14 = vpop.f32.mrb[6].mxu1 }
 0x2ea   : > { %v627_v15 = vmax.f32 %v621_v11, 0.0  ;;  %v625_v16 = vpop.f32.mrb[7].mxu1 }
 0x2eb   : > { %v628_v17 = vmax.f32 %v623_v13, 0.0 }
 0x2ec   : > { %v630_v18 = vpack.c.bf16 %v627_v15, %v627_v15 }
 0x2ed   : > { %v631_v19 = vpack.c.bf16 %v628_v17, %v628_v17 }
 0x2ee   : > { %v644_v20 = vsel %vm642_vm2, %v630_v18, 0 }
 0x2ef   : > { %815 = vmatprep.subr.msk.bf16.mxu0 %vm642_vm2, %v631_v19 }
 0x2f0   : > { %650 = vmatpush1.bf16.msra.mxu0 %v644_v20 }
 0x2f3   : > { %816 = vmatmul.mubr.msk.bf16.vlgmr.msra.gmra.mrb[8].mxu0 %vm638_vm3, %v629_v21 }
 0x3c6   : > { %v683_v23 = vpop.f32.mrb[8].mxu0 }
 0x3c7   : > { %v684_v24 = vadd.f32 %v683_v23, %v636_v22  ;;  %v685_v25 = vpop.f32.mrb[9].mxu0 }
 0x3c8   : > { %v686_v26 = vadd.f32 %v685_v25, %v636_v22  ;;  %v687_v27 = vpop.f32.mrb[10].mxu0 }
 0x3c9   : > { %899 = vtanh.f32 %v684_v24  ;;  %v688_v28 = vpop.f32.mrb[11].mxu0 }
 0x3ca   : > { %901 = vtanh.f32 %v686_v26 }
 0x3d3   : > { %v900_v29 = vpop.eup %899 }
 0x3d4   : > { %v902_v30 = vpop.eup %901 }
 0x3d5   : > { %v694_v31 = vcombine.low %v900_v29, %v902_v30 }
 0x3d7   : > { %696 = vst [vmem:[%s379_s20] sm:$0x77] %v694_v31 }
 0x3d8 PF: > { %s22_s16 = sadd.s32 1, %s999_s16   ;;  %s1281_s18 = sld [smem:[#allocation7_spill]] }
 0x3d9   : > { %p19_p5 = scmp.ge.s32.totalorder %s22_s16, 6   ;;  %s1282_s30 = smov %s975_s10 }
 0x3da   : > { %s1283_s10 = smov %s979_s11  ;;  %s1284_s11 = smov %s1123_s29 }
 0x3db   : > { %s1285_s12 = smov %s991_s14  ;;  %s1286_s13 = smov %s995_s15 }
 0x3dc   : > { %s1288_s15 = smov %s1294_s19  ;;  %21 = sbr.rel (!%p19_p5) target bundleno = 9 (0x9), region = 96 }
 0x3de   : > { %s1287_s14 = smov %s1281_s18 }
 0x3e3   :  { %727 = vsyncpa [#allocation3], 1 }
 0x3e4   :  { %729 = vsyncpa [#allocation3 + $0x1], 1 }

</bundles_post_ra>
